<compile_context>
chip_gen: v5e
topology: v5e:2x2
jax: 0.10.0
libtpu: 0.0.40
codegen_flags: <defaults>
</compile_context>

<pallas_src>
import math

import jax
import jax.numpy as jnp
import numpy as np
from jax.experimental import pallas as pl
from jax.experimental.pallas import tpu as pltpu


# ---------------------------------------------------------------------------
# Schedule setup (glue, plain JAX — mirrors AirfoilDiffusion.__init__)
# ---------------------------------------------------------------------------
def _cosine_variance_schedule(timesteps, epsilon=0.008):
    steps = jnp.linspace(0.0, float(timesteps), timesteps + 1, dtype=jnp.float32)
    f_t = jnp.cos((steps / timesteps + epsilon) / (1.0 + epsilon) * math.pi * 0.5) ** 2
    betas = jnp.clip(1.0 - f_t[1:] / f_t[:timesteps], 0.0, 0.999)
    return betas


# ---------------------------------------------------------------------------
# Pallas kernel: forward diffusion as a lane-dense streaming axpy
#   q[b, :] = coef_x[b] * x[b, :] + coef_n[b] * noise[b, :]
# coef_x / coef_n arrive as f32 [rows, 1] columns and broadcast over lanes.
# Accumulation is in f32 even for bf16 I/O; only the output store casts.
# ---------------------------------------------------------------------------
def _forward_diffusion_kernel(cx_ref, cn_ref, x_ref, n_ref, q_ref):
    x = x_ref[...].astype(jnp.float32)
    n = n_ref[...].astype(jnp.float32)
    q_ref[...] = (cx_ref[...] * x + cn_ref[...] * n).astype(q_ref.dtype)


def _sublane_multiple(itemsize):
    # f32 -> 8, bf16 -> 16, int8/fp8 -> 32 sublane packing
    return {4: 8, 2: 16, 1: 32}.get(int(itemsize), 8)


def _choose_blocks(B, F_pad, itemsize, target_bytes=4 * 1024 * 1024):
    """Pick (row_block, lane_block) so one input block is <= ~4 MiB.

    4 MiB/block * 3 streamed arrays (x, noise, out) * 2 pipeline buffers
    ~= 24 MiB of VMEM: fits v7x's 32 MiB default scoped limit (64 MiB physical)
    and, with the explicit vmem_limit_bytes below, v5e/v6e as well, while each
    grid step still moves MBs (>> the ~0.35 us per-step overhead).  Lane blocks
    are multiples of 128 (unmasked vst); row blocks are multiples of the dtype
    sublane packing or the full batch extent.
    """
    sub = _sublane_multiple(itemsize)
    bm = B if B <= 1024 else 1024                       # 1024 is a multiple of 8/16/32
    lanes_for_target = (target_bytes // max(1, bm * itemsize)) // 128 * 128
    bf = int(min(F_pad, max(128, lanes_for_target)))
    while bm > sub and bm * bf * itemsize > target_bytes:   # safety (rarely taken)
        bm = max(sub, (bm // 2) // sub * sub)
    if bm >= B:
        bm = B                                          # full-dim block is always legal
    return int(bm), int(bf)


def forward_diffusion_pallas(x, noise, sa_t, soma_t, cl_cd):
    B, C, L = x.shape
    F = C * L
    itemsize = x.dtype.itemsize

    # Per-batch scalar math stays in f32 (cheap, plain JAX); presented as
    # [B, 1] columns for in-kernel lane broadcast.
    coef_x = (sa_t.astype(jnp.float32)
              * (1.0 + 0.1 * cl_cd[:, 0].astype(jnp.float32))).reshape(B, 1)
    coef_n = (soma_t.astype(jnp.float32)
              * (1.0 + 0.1 * cl_cd[:, 1].astype(jnp.float32))).reshape(B, 1)

    # Lane-dense 2D slab; pad the lane dim to a multiple of 128 so the output
    # spec lowers to unmasked vector stores (no-op when already aligned).
    x2 = x.reshape(B, F)
    n2 = noise.reshape(B, F)
    F_pad = max(128, ((F + 127) // 128) * 128)
    if F_pad != F:
        x2 = jnp.pad(x2, ((0, 0), (0, F_pad - F)))
        n2 = jnp.pad(n2, ((0, 0), (0, F_pad - F)))

    bm, bf = _choose_blocks(B, F_pad, itemsize)
    grid = (pl.cdiv(B, bm), pl.cdiv(F_pad, bf))

    data_map = lambda i, j: (i, j)
    coef_map = lambda i, j: (i, 0)

    q2 = pl.pallas_call(
        _forward_diffusion_kernel,
        out_shape=jax.ShapeDtypeStruct((B, F_pad), x.dtype),
        grid=grid,
        in_specs=[
            pl.BlockSpec((bm, 1), coef_map),    # coef_x column (f32)
            pl.BlockSpec((bm, 1), coef_map),    # coef_n column (f32)
            pl.BlockSpec((bm, bf), data_map),   # x slab
            pl.BlockSpec((bm, bf), data_map),   # noise slab
        ],
        out_specs=pl.BlockSpec((bm, bf), data_map),
        compiler_params=pltpu.CompilerParams(
            # Both axes are elementwise-independent: megacore (v7x 2 TCs) can
            # shard either one; no-op on single-TC v5e/v6e.
            dimension_semantics=("parallel", "parallel"),
            # Raise the scoped-VMEM limit above v5e's 16 MiB default while
            # staying well inside v7x's 64 MiB physical VMEM.
            vmem_limit_bytes=48 * 1024 * 1024,
        ),
        cost_estimate=pl.CostEstimate(
            flops=3 * B * F_pad,
            transcendentals=0,
            bytes_accessed=3 * B * F_pad * itemsize + 2 * B * 4,
        ),
    )(coef_x, coef_n, x2, n2)

    if F_pad != F:
        q2 = q2[:, :F]
    return q2.reshape(B, C, L)


# ---------------------------------------------------------------------------
# Module wrapper (mirrors AirfoilDiffusion)
# ---------------------------------------------------------------------------
class AirfoilDiffusionJAX:
    def __init__(self, latent_size, in_channels, out_channels,
                 time_embedding_dim=256, timesteps=1000, base_dim=32,
                 dim_mults=(1, 2, 4, 8)):
        self.latent_size = latent_size
        self.in_channels = in_channels
        self.timesteps = timesteps
        self.beta = _cosine_variance_schedule(timesteps)
        self.alpha = 1.0 - self.beta
        self.alpha_bar = jnp.cumprod(self.alpha, axis=-1)
        self.alpha_prev_bar = jnp.concatenate(
            [jnp.array([1.0], dtype=jnp.float32), self.alpha_bar[:-1]], axis=0)
        self.sqrt_alpha_bar = jnp.sqrt(self.alpha_bar)
        self.sqrt_one_minus_alpha_bar = jnp.sqrt(1.0 - self.alpha_bar)
        # TODO(synk): the `Unet(...)` denoiser class is not defined in the provided
        # models.py source, so `self.model` cannot be reproduced; forward() returns
        # the diffused latent x_t (everything defined in the reference) instead.

    def forward(self, x, noise, cl_cd, key):
        # torch.randint(0, timesteps, (B,)) equivalent (deterministic key)
        t = jax.random.randint(key, (x.shape[0],), 0, self.timesteps)
        sa_t = self.sqrt_alpha_bar[t].astype(jnp.float32)
        soma_t = self.sqrt_one_minus_alpha_bar[t].astype(jnp.float32)
        x_t = forward_diffusion_pallas(x, noise, sa_t, soma_t, cl_cd)
        return x_t, t


def _forward_diffusion_ref(x, noise, sa_t, soma_t, cl_cd):
    cl = cl_cd[:, 0][:, None, None]
    cd = cl_cd[:, 1][:, None, None]
    a = sa_t[:, None, None]
    s = soma_t[:, None, None]
    return a * x * (1.0 + 0.1 * cl) + s * noise * (1.0 + 0.1 * cd)


if __name__ == "__main__":
    B, C, L = 2, 4, 16          # batch, in_channels, latent_size
    key = jax.random.PRNGKey(0)
    kx, kn, kc, kt = jax.random.split(key, 4)

    x = jax.random.normal(kx, (B, C, L), dtype=jnp.float32)
    noise = jax.random.normal(kn, (B, C, L), dtype=jnp.float32)
    cl_cd = jax.random.normal(kc, (B, 2), dtype=jnp.float32)

    model = AirfoilDiffusionJAX(latent_size=L, in_channels=C, out_channels=C,
                                timesteps=1000)

    x_t, t = model.forward(x, noise, cl_cd, kt)
    x_t = jax.block_until_ready(x_t)

    # correctness check against pure-JAX reference
    sa_t = model.sqrt_alpha_bar[t]
    soma_t = model.sqrt_one_minus_alpha_bar[t]
    ref = _forward_diffusion_ref(x, noise, sa_t, soma_t, cl_cd)
    np.testing.assert_allclose(np.asarray(x_t), np.asarray(ref),
                               rtol=1e-5, atol=1e-5)

    print("KERNEL_OK")
</pallas_src>

<mosaic_0001>
module attributes {stable_mosaic.version = 11 : i64} {
  func.func @_forward_diffusion_kernel(%arg0: i32, %arg1: i32, %arg2: memref<2x1xf32, #tpu.memory_space<vmem>>, %arg3: memref<2x1xf32, #tpu.memory_space<vmem>>, %arg4: memref<2x128xf32, #tpu.memory_space<vmem>>, %arg5: memref<2x128xf32, #tpu.memory_space<vmem>>, %arg6: memref<2x128xf32, #tpu.memory_space<vmem>>) attributes {dimension_semantics = [#tpu.dimension_semantics<parallel>, #tpu.dimension_semantics<parallel>], iteration_bounds = array<i64: 1, 1>, scalar_prefetch = 0 : i64, scratch_operands = 0 : i64, tpu.core_type = #tpu.core_type<tc>, window_params = [{transform_indices = @transform_0, window_bounds = array<i64: 2, 1>}, {transform_indices = @transform_1, window_bounds = array<i64: 2, 1>}, {transform_indices = @transform_2, window_bounds = array<i64: 2, 128>}, {transform_indices = @transform_3, window_bounds = array<i64: 2, 128>}, {transform_indices = @transform_4, window_bounds = array<i64: 2, 128>}]} {
    %c0 = arith.constant 0 : index
    %c0_0 = arith.constant 0 : index
    %0 = vector.load %arg4[%c0, %c0_0] : memref<2x128xf32, #tpu.memory_space<vmem>>, vector<2x128xf32>
    %c0_1 = arith.constant 0 : index
    %c0_2 = arith.constant 0 : index
    %1 = vector.load %arg5[%c0_1, %c0_2] : memref<2x128xf32, #tpu.memory_space<vmem>>, vector<2x128xf32>
    %c0_3 = arith.constant 0 : index
    %c0_4 = arith.constant 0 : index
    %2 = vector.load %arg2[%c0_3, %c0_4] : memref<2x1xf32, #tpu.memory_space<vmem>>, vector<2x1xf32>
    %3 = vector.broadcast %2 : vector<2x1xf32> to vector<2x128xf32>
    %4 = arith.mulf %3, %0 : vector<2x128xf32>
    %c0_5 = arith.constant 0 : index
    %c0_6 = arith.constant 0 : index
    %5 = vector.load %arg3[%c0_5, %c0_6] : memref<2x1xf32, #tpu.memory_space<vmem>>, vector<2x1xf32>
    %6 = vector.broadcast %5 : vector<2x1xf32> to vector<2x128xf32>
    %7 = arith.mulf %6, %1 : vector<2x128xf32>
    %8 = arith.addf %4, %7 : vector<2x128xf32>
    %c0_7 = arith.constant 0 : index
    %c0_8 = arith.constant 0 : index
    %9 = vector.load %arg6[%c0_7, %c0_8] : memref<2x128xf32, #tpu.memory_space<vmem>>, vector<2x128xf32>
    tpu.vector_store %arg6[%c0_7, %c0_8], %8 {strides = array<i32>} : memref<2x128xf32, #tpu.memory_space<vmem>>, vector<2x128xf32>,
    return
  }
  func.func @transform_0(%arg0: i32, %arg1: i32) -> (i32, i32) {
    %c0_i32 = arith.constant 0 : i32
    %c0_i32_0 = arith.constant 0 : i32
    return %arg0, %c0_i32 : i32, i32
  }
  func.func @transform_1(%arg0: i32, %arg1: i32) -> (i32, i32) {
    %c0_i32 = arith.constant 0 : i32
    %c0_i32_0 = arith.constant 0 : i32
    return %arg0, %c0_i32 : i32, i32
  }
  func.func @transform_2(%arg0: i32, %arg1: i32) -> (i32, i32) {
    %c0_i32 = arith.constant 0 : i32
    return %arg0, %arg1 : i32, i32
  }
  func.func @transform_3(%arg0: i32, %arg1: i32) -> (i32, i32) {
    %c0_i32 = arith.constant 0 : i32
    return %arg0, %arg1 : i32, i32
  }
  func.func @transform_4(%arg0: i32, %arg1: i32) -> (i32, i32) {
    %c0_i32 = arith.constant 0 : i32
    return %arg0, %arg1 : i32, i32
  }
}

</mosaic_0001>

<bundles_post_ra>
// kernel: tpu_custom_call.1
= control target key start
LH: loop header
LB: loop body
LE: loop exit
PB: predicated region body
PF: predicated region fallthrough
CT: control target
= control target key end

     0   :  { %v81_v1 = vmov 0   ;;  %s123_s0 = inlined_call_operand.vmem [shape: f32[2,1], index: 0, kind: input, shape index: {}]   ;;  %s124_s1 = inlined_call_operand.vmem [shape: f32[2,1], index: 1, kind: input, shape index: {}]   ;;  %s125_s2 = inlined_call_operand.vmem [shape: f32[2,128], index: 2, kind: input, shape index: {}]   ;;  %s126_s3 = inlined_call_operand.vmem [shape: f32[2,128], index: 3, kind: input, shape index: {}]   ;;  %s127_s4 = inlined_call_operand.hbm [shape: f32[2,128], index: 4, kind: output, shape index: {}]  }
   0x1   :  { %v20_v0 = vld [vmem:[%s123_s0] sm:$0x3]  ;;  %54 = vset.pattern.permute.xlu0 %v81_v1 }
   0x2   :  { %9 = vsyncpa [#allocation3], 0  ;;  %23 = vperm.xlu0 %54, %v20_v0   ;;  %v27_v2 = vld [vmem:[%s124_s1] sm:$0x3]  ;;  %s82_s0 = smov [#allocation2]   ;;  %s43_s26 = sshll.u32 %s127_s4, 4  ;;  %s44_s26 = int_to_ptr.hbm [resolvable:$true] %s43_s26 }
   0x3   :  { %v18_v4 = vld [vmem:[%s125_s2] sm:$0x3]  ;;  %s41_s23 = sshll.u32 %s82_s0, 4  ;;  %s42_s23 = int_to_ptr.vmem [resolvable:$true] %s41_s23 }
   0x4   :  { %v19_v5 = vld [vmem:[%s126_s3] sm:$0x3] }
   0xa   :  { %30 = vperm.xlu0 %54, %v27_v2  }
  0x74   :  { %v24_v3 = vpop.permute.xlu0 %23 }
  0x75   :  { %v26_v7 = vmul.f32 %v24_v3, %v18_v4 }
  0x7c   :  { %v31_v6 = vpop.permute.xlu0 %30 }
  0x7d   :  { %v33_v8 = vmul.f32 %v31_v6, %v19_v5 }
  0x7f   :  { %v34_v9 = vadd.f32 %v33_v8, %v26_v7 }
  0x81   :  { %35 = vst [vmem:[#allocation2] sm:$0x3] %v34_v9 }
  0x82   :  { %46 = dma.vmem_to_hbm [thread:$0]  %s42_s23, 32, %s44_s26, [#allocation3]  }
  0x83   :  { %79 = dma.done.wait [#allocation3], 32  }
  0x84   :  { %80 = vsyncadd [#allocation3], 4294967264 }
  0x85   :  { %51 = vsyncpa [#allocation3], 1 }

</bundles_post_ra>
